<compile_context>
chip_gen: v7x
topology: tpu7x:2x2x1
jax: 0.10.0
libtpu: 0.0.40
codegen_flags: <defaults>
</compile_context>

<pallas_src>
import functools

import jax
import jax.numpy as jnp
from jax.experimental import pallas as pl
from jax.experimental.pallas import tpu as pltpu


def _elu(x):
    # F.elu, alpha=1.0.  (exp(x)-1 instead of expm1 keeps the Mosaic lowering
    # trivially supported; precision delta near 0 is negligible here.)
    return jnp.where(x > 0.0, x, jnp.exp(x) - 1.0)


def _round_up(n, m):
    return ((n + m - 1) // m) * m


def cdn_select_kernel(x_ref, w1_ref, b1_ref, w2_ref, b2_ref,
                      w3_ref, b3_ref, w4_ref, b4_ref, o_ref):
    wdt = w1_ref.dtype
    x = x_ref[...]                                                    # [6, TB]

    # fc1 + ELU  -> [64, TB] (f32 accumulation, f32 elementwise)
    h1 = _elu(jnp.dot(w1_ref[...], x,
                      preferred_element_type=jnp.float32) + b1_ref[...])
    # fc2 + ELU  -> [128, TB]
    h2 = _elu(jnp.dot(w2_ref[...], h1.astype(wdt),
                      preferred_element_type=jnp.float32) + b2_ref[...])
    # fc3 + ELU  -> [32, TB]
    h3 = _elu(jnp.dot(w3_ref[...], h2.astype(wdt),
                      preferred_element_type=jnp.float32) + b3_ref[...])
    # output layer -> logits [3, TB]
    logits = jnp.dot(w4_ref[...], h3.astype(wdt),
                     preferred_element_type=jnp.float32) + b4_ref[...]

    # softmax over the feature axis (dim=1 of the original [B, 3] layout)
    m = jnp.max(logits, axis=0, keepdims=True)
    e = jnp.exp(logits - m)
    denom = jnp.sum(e, axis=0, keepdims=True)
    o_ref[...] = (e * pl.reciprocal(denom, approx=True)).astype(o_ref.dtype)


@functools.partial(jax.jit, static_argnames=("tile_b",))
def cdn_select_forward(x, params, tile_b=2048):
    """x: [B, C, H, 3] float32 (NCHW-style).  Returns action_probs [B, 3] f32."""
    assert tile_b % 128 == 0
    B = x.shape[0]
    wdt = params["w1"].dtype

    # Glue: states = x[:,0,0,:], rewards = x[:,0,1,:]; concat on the feature
    # axis == reshape of x[:, 0, :2, :].  Transpose to feature-major so batch
    # lands on the lane axis, and cast to the matmul dtype here so the streamed
    # HBM bytes are already narrow.
    feats = x[:, 0, :2, :].reshape(B, 6)             # == cat([states, rewards], 1)
    xt = jnp.transpose(feats).astype(wdt)            # [6, B]

    tb = min(tile_b, _round_up(max(B, 1), 128))
    b_pad = _round_up(B, tb)
    if b_pad != B:
        xt = jnp.pad(xt, ((0, 0), (0, b_pad - B)))   # padded cols are harmless

    grid = (b_pad // tb,)

    def const_spec(a):
        return pl.BlockSpec(a.shape, lambda i: (0,) * a.ndim)

    w1, b1 = params["w1"], params["b1"]
    w2, b2 = params["w2"], params["b2"]
    w3, b3 = params["w3"], params["b3"]
    w4, b4 = params["w4"], params["b4"]

    param_bytes = sum(int(p.size) * p.dtype.itemsize
                      for p in (w1, b1, w2, b2, w3, b3, w4, b4))
    cost = pl.CostEstimate(
        flops=2 * b_pad * (6 * 64 + 64 * 128 + 128 * 32 + 32 * 3),
        transcendentals=b_pad * (64 + 128 + 32 + 3),
        bytes_accessed=(xt.size * xt.dtype.itemsize
                        + b_pad * 3 * 4
                        + param_bytes),
    )

    out = pl.pallas_call(
        cdn_select_kernel,
        out_shape=jax.ShapeDtypeStruct((3, b_pad), jnp.float32),
        grid=grid,
        in_specs=[
            pl.BlockSpec((6, tb), lambda i: (0, i)),   # streamed input tile
            const_spec(w1), const_spec(b1),            # resident params
            const_spec(w2), const_spec(b2),
            const_spec(w3), const_spec(b3),
            const_spec(w4), const_spec(b4),
        ],
        out_specs=pl.BlockSpec((3, tb), lambda i: (0, i)),
        compiler_params=pltpu.CompilerParams(
            dimension_semantics=("parallel",)),
        cost_estimate=cost,
    )(xt, w1, b1, w2, b2, w3, b3, w4, b4)

    return jnp.transpose(out[:, :B])                   # [B, 3]


def _xavier_uniform(key, fan_out, fan_in, dtype):
    # nn.init.xavier_uniform_ on a Linear weight of shape (out, in)
    # (PyTorch-native layout; the kernel is feature-major so no transpose).
    bound = jnp.sqrt(6.0 / (fan_in + fan_out))
    w = jax.random.uniform(key, (fan_out, fan_in),
                           dtype=jnp.float32, minval=-bound, maxval=bound)
    return w.astype(dtype)


def init_params(key, dtype=jnp.bfloat16):
    k1, k2, k3, k4 = jax.random.split(key, 4)
    return {
        "w1": _xavier_uniform(k1, 64, 6, dtype),
        "b1": jnp.zeros((64, 1), jnp.float32),
        "w2": _xavier_uniform(k2, 128, 64, dtype),
        "b2": jnp.zeros((128, 1), jnp.float32),
        "w3": _xavier_uniform(k3, 32, 128, dtype),
        "b3": jnp.zeros((32, 1), jnp.float32),
        "w4": _xavier_uniform(k4, 3, 32, dtype),
        "b4": jnp.zeros((3, 1), jnp.float32),
    }


def _reference_forward(x, params):
    """Pure-JAX reference (f32) of the PyTorch forward in eval mode."""
    B = x.shape[0]
    cat_input = x[:, 0, :2, :].reshape(B, 6)
    h = cat_input
    for wk, bk in (("w1", "b1"), ("w2", "b2"), ("w3", "b3")):
        h = jax.nn.elu(h @ params[wk].astype(jnp.float32).T
                       + params[bk].reshape(1, -1))
    logits = h @ params["w4"].astype(jnp.float32).T + params["b4"].reshape(1, -1)
    return jax.nn.softmax(logits, axis=1)


if __name__ == "__main__":
    key = jax.random.PRNGKey(0)
    pkey, xkey = jax.random.split(key)

    params = init_params(pkey, dtype=jnp.bfloat16)

    # x: [batch=2, channels=1, rows=2 (states/rewards), width=3]
    x = jax.random.normal(xkey, (2, 1, 2, 3), dtype=jnp.float32)

    probs = cdn_select_forward(x, params)
    probs = jax.block_until_ready(probs)

    assert probs.shape == (2, 3)
    # rows sum to ~1 (approx reciprocal + bf16 matmuls -> loose tolerance)
    assert jnp.allclose(jnp.sum(probs, axis=1), 1.0, atol=5e-3)
    # matches the pure-JAX f32 reference up to bf16 matmul error
    ref = _reference_forward(x, params)
    assert jnp.allclose(probs, ref, atol=3e-2)

    print("KERNEL_OK")
</pallas_src>

<mosaic_0001>
module attributes {stable_mosaic.version = 11 : i64} {
  func.func @cdn_select_kernel(%arg0: i32, %arg1: memref<6x128xbf16, #tpu.memory_space<vmem>>, %arg2: memref<64x6xbf16, #tpu.memory_space<vmem>>, %arg3: memref<64x1xf32, #tpu.memory_space<vmem>>, %arg4: memref<128x64xbf16, #tpu.memory_space<vmem>>, %arg5: memref<128x1xf32, #tpu.memory_space<vmem>>, %arg6: memref<32x128xbf16, #tpu.memory_space<vmem>>, %arg7: memref<32x1xf32, #tpu.memory_space<vmem>>, %arg8: memref<3x32xbf16, #tpu.memory_space<vmem>>, %arg9: memref<3x1xf32, #tpu.memory_space<vmem>>, %arg10: memref<3x128xf32, #tpu.memory_space<vmem>>) attributes {dimension_semantics = [#tpu.dimension_semantics<parallel>], iteration_bounds = array<i64: 1>, scalar_prefetch = 0 : i64, scratch_operands = 0 : i64, tpu.core_type = #tpu.core_type<tc>, window_params = [{transform_indices = @transform_0, window_bounds = array<i64: 6, 128>}, {pipeline_mode = #tpu.pipeline_mode<synchronous>, transform_indices = @transform_1, window_bounds = array<i64: 64, 6>}, {pipeline_mode = #tpu.pipeline_mode<synchronous>, transform_indices = @transform_2, window_bounds = array<i64: 64, 1>}, {pipeline_mode = #tpu.pipeline_mode<synchronous>, transform_indices = @transform_3, window_bounds = array<i64: 128, 64>}, {pipeline_mode = #tpu.pipeline_mode<synchronous>, transform_indices = @transform_4, window_bounds = array<i64: 128, 1>}, {pipeline_mode = #tpu.pipeline_mode<synchronous>, transform_indices = @transform_5, window_bounds = array<i64: 32, 128>}, {pipeline_mode = #tpu.pipeline_mode<synchronous>, transform_indices = @transform_6, window_bounds = array<i64: 32, 1>}, {pipeline_mode = #tpu.pipeline_mode<synchronous>, transform_indices = @transform_7, window_bounds = array<i64: 3, 32>}, {pipeline_mode = #tpu.pipeline_mode<synchronous>, transform_indices = @transform_8, window_bounds = array<i64: 3, 1>}, {transform_indices = @transform_9, window_bounds = array<i64: 3, 128>}]} {
    %c0 = arith.constant 0 : index
    %c0_0 = arith.constant 0 : index
    %0 = vector.load %arg1[%c0, %c0_0] : memref<6x128xbf16, #tpu.memory_space<vmem>>, vector<6x128xbf16>
    %c0_1 = arith.constant 0 : index
    %c0_2 = arith.constant 0 : index
    %1 = vector.load %arg2[%c0_1, %c0_2] : memref<64x6xbf16, #tpu.memory_space<vmem>>, vector<64x6xbf16>
    %cst = arith.constant dense<0.000000e+00> : vector<64x128xf32>
    %2 = tpu.matmul %1, %0, %cst {dimension_numbers = #tpu.dot_dimension_numbers<[1], [0], [0], [1], [0, 0, 1, 1], [], []>} : vector<64x6xbf16>, vector<6x128xbf16>, vector<64x128xf32> -> vector<64x128xf32>
    %c0_3 = arith.constant 0 : index
    %c0_4 = arith.constant 0 : index
    %3 = vector.load %arg3[%c0_3, %c0_4] : memref<64x1xf32, #tpu.memory_space<vmem>>, vector<64x1xf32>
    %4 = vector.broadcast %3 : vector<64x1xf32> to vector<64x128xf32>
    %5 = arith.addf %2, %4 : vector<64x128xf32>
    %cst_5 = arith.constant 0.000000e+00 : f32
    %6 = vector.broadcast %cst_5 : f32 to vector<64x128xf32>
    %7 = arith.cmpf ogt, %5, %6 : vector<64x128xf32>
    %8 = math.exp %5 : vector<64x128xf32>
    %cst_6 = arith.constant 1.000000e+00 : f32
    %9 = vector.broadcast %cst_6 : f32 to vector<64x128xf32>
    %10 = arith.subf %8, %9 : vector<64x128xf32>
    %11 = arith.select %7, %5, %10 : vector<64x128xi1>, vector<64x128xf32>
    %c0_7 = arith.constant 0 : index
    %c0_8 = arith.constant 0 : index
    %12 = vector.load %arg4[%c0_7, %c0_8] : memref<128x64xbf16, #tpu.memory_space<vmem>>, vector<128x64xbf16>
    %13 = arith.truncf %11 : vector<64x128xf32> to vector<64x128xbf16>
    %cst_9 = arith.constant dense<0.000000e+00> : vector<128x128xf32>
    %14 = tpu.matmul %12, %13, %cst_9 {dimension_numbers = #tpu.dot_dimension_numbers<[1], [0], [0], [1], [0, 0, 1, 1], [], []>} : vector<128x64xbf16>, vector<64x128xbf16>, vector<128x128xf32> -> vector<128x128xf32>
    %c0_10 = arith.constant 0 : index
    %c0_11 = arith.constant 0 : index
    %15 = vector.load %arg5[%c0_10, %c0_11] : memref<128x1xf32, #tpu.memory_space<vmem>>, vector<128x1xf32>
    %16 = vector.broadcast %15 : vector<128x1xf32> to vector<128x128xf32>
    %17 = arith.addf %14, %16 : vector<128x128xf32>
    %cst_12 = arith.constant 0.000000e+00 : f32
    %18 = vector.broadcast %cst_12 : f32 to vector<128x128xf32>
    %19 = arith.cmpf ogt, %17, %18 : vector<128x128xf32>
    %20 = math.exp %17 : vector<128x128xf32>
    %cst_13 = arith.constant 1.000000e+00 : f32
    %21 = vector.broadcast %cst_13 : f32 to vector<128x128xf32>
    %22 = arith.subf %20, %21 : vector<128x128xf32>
    %23 = arith.select %19, %17, %22 : vector<128x128xi1>, vector<128x128xf32>
    %c0_14 = arith.constant 0 : index
    %c0_15 = arith.constant 0 : index
    %24 = vector.load %arg6[%c0_14, %c0_15] : memref<32x128xbf16, #tpu.memory_space<vmem>>, vector<32x128xbf16>
    %25 = arith.truncf %23 : vector<128x128xf32> to vector<128x128xbf16>
    %cst_16 = arith.constant dense<0.000000e+00> : vector<32x128xf32>
    %26 = tpu.matmul %24, %25, %cst_16 {dimension_numbers = #tpu.dot_dimension_numbers<[1], [0], [0], [1], [0, 0, 1, 1], [], []>} : vector<32x128xbf16>, vector<128x128xbf16>, vector<32x128xf32> -> vector<32x128xf32>
    %c0_17 = arith.constant 0 : index
    %c0_18 = arith.constant 0 : index
    %27 = vector.load %arg7[%c0_17, %c0_18] : memref<32x1xf32, #tpu.memory_space<vmem>>, vector<32x1xf32>
    %28 = vector.broadcast %27 : vector<32x1xf32> to vector<32x128xf32>
    %29 = arith.addf %26, %28 : vector<32x128xf32>
    %cst_19 = arith.constant 0.000000e+00 : f32
    %30 = vector.broadcast %cst_19 : f32 to vector<32x128xf32>
    %31 = arith.cmpf ogt, %29, %30 : vector<32x128xf32>
    %32 = math.exp %29 : vector<32x128xf32>
    %cst_20 = arith.constant 1.000000e+00 : f32
    %33 = vector.broadcast %cst_20 : f32 to vector<32x128xf32>
    %34 = arith.subf %32, %33 : vector<32x128xf32>
    %35 = arith.select %31, %29, %34 : vector<32x128xi1>, vector<32x128xf32>
    %c0_21 = arith.constant 0 : index
    %c0_22 = arith.constant 0 : index
    %36 = vector.load %arg8[%c0_21, %c0_22] : memref<3x32xbf16, #tpu.memory_space<vmem>>, vector<3x32xbf16>
    %37 = arith.truncf %35 : vector<32x128xf32> to vector<32x128xbf16>
    %cst_23 = arith.constant dense<0.000000e+00> : vector<3x128xf32>
    %38 = tpu.matmul %36, %37, %cst_23 {dimension_numbers = #tpu.dot_dimension_numbers<[1], [0], [0], [1], [0, 0, 1, 1], [], []>} : vector<3x32xbf16>, vector<32x128xbf16>, vector<3x128xf32> -> vector<3x128xf32>
    %c0_24 = arith.constant 0 : index
    %c0_25 = arith.constant 0 : index
    %39 = vector.load %arg9[%c0_24, %c0_25] : memref<3x1xf32, #tpu.memory_space<vmem>>, vector<3x1xf32>
    %40 = vector.broadcast %39 : vector<3x1xf32> to vector<3x128xf32>
    %41 = arith.addf %38, %40 : vector<3x128xf32>
    %cst_26 = arith.constant dense<0xFF800000> : vector<128xf32>
    %42 = vector.multi_reduction <maximumf>, %41, %cst_26 [0] : vector<3x128xf32> to vector<128xf32>
    %43 = vector.shape_cast %42 : vector<128xf32> to vector<1x128xf32>
    %44 = vector.broadcast %43 : vector<1x128xf32> to vector<3x128xf32>
    %45 = arith.subf %41, %44 : vector<3x128xf32>
    %46 = math.exp %45 : vector<3x128xf32>
    %cst_27 = arith.constant dense<0.000000e+00> : vector<128xf32>
    %47 = vector.multi_reduction <add>, %46, %cst_27 [0] : vector<3x128xf32> to vector<128xf32>
    %48 = vector.shape_cast %47 : vector<128xf32> to vector<1x128xf32>
    %49 = tpu.reciprocal %48 {approx = true} : vector<1x128xf32> -> vector<1x128xf32>
    %50 = vector.broadcast %49 : vector<1x128xf32> to vector<3x128xf32>
    %51 = arith.mulf %46, %50 : vector<3x128xf32>
    %c0_28 = arith.constant 0 : index
    %c0_29 = arith.constant 0 : index
    %52 = vector.load %arg10[%c0_28, %c0_29] : memref<3x128xf32, #tpu.memory_space<vmem>>, vector<3x128xf32>
    tpu.vector_store %arg10[%c0_28, %c0_29], %51 {strides = array<i32>} : memref<3x128xf32, #tpu.memory_space<vmem>>, vector<3x128xf32>,
    return
  }
  func.func @transform_0(%arg0: i32) -> (i32, i32) {
    %c0_i32 = arith.constant 0 : i32
    %c0_i32_0 = arith.constant 0 : i32
    return %c0_i32, %arg0 : i32, i32
  }
  func.func @transform_1(%arg0: i32) -> (i32, i32) {
    %c0_i32 = arith.constant 0 : i32
    %c0_i32_0 = arith.constant 0 : i32
    %c0_i32_1 = arith.constant 0 : i32
    return %c0_i32, %c0_i32_0 : i32, i32
  }
  func.func @transform_2(%arg0: i32) -> (i32, i32) {
    %c0_i32 = arith.constant 0 : i32
    %c0_i32_0 = arith.constant 0 : i32
    %c0_i32_1 = arith.constant 0 : i32
    return %c0_i32, %c0_i32_0 : i32, i32
  }
  func.func @transform_3(%arg0: i32) -> (i32, i32) {
    %c0_i32 = arith.constant 0 : i32
    %c0_i32_0 = arith.constant 0 : i32
    %c0_i32_1 = arith.constant 0 : i32
    return %c0_i32, %c0_i32_0 : i32, i32
  }
  func.func @transform_4(%arg0: i32) -> (i32, i32) {
    %c0_i32 = arith.constant 0 : i32
    %c0_i32_0 = arith.constant 0 : i32
    %c0_i32_1 = arith.constant 0 : i32
    return %c0_i32, %c0_i32_0 : i32, i32
  }
  func.func @transform_5(%arg0: i32) -> (i32, i32) {
    %c0_i32 = arith.constant 0 : i32
    %c0_i32_0 = arith.constant 0 : i32
    %c0_i32_1 = arith.constant 0 : i32
    return %c0_i32, %c0_i32_0 : i32, i32
  }
  func.func @transform_6(%arg0: i32) -> (i32, i32) {
    %c0_i32 = arith.constant 0 : i32
    %c0_i32_0 = arith.constant 0 : i32
    %c0_i32_1 = arith.constant 0 : i32
    return %c0_i32, %c0_i32_0 : i32, i32
  }
  func.func @transform_7(%arg0: i32) -> (i32, i32) {
    %c0_i32 = arith.constant 0 : i32
    %c0_i32_0 = arith.constant 0 : i32
    %c0_i32_1 = arith.constant 0 : i32
    return %c0_i32, %c0_i32_0 : i32, i32
  }
  func.func @transform_8(%arg0: i32) -> (i32, i32) {
    %c0_i32 = arith.constant 0 : i32
    %c0_i32_0 = arith.constant 0 : i32
    %c0_i32_1 = arith.constant 0 : i32
    return %c0_i32, %c0_i32_0 : i32, i32
  }
  func.func @transform_9(%arg0: i32) -> (i32, i32) {
    %c0_i32 = arith.constant 0 : i32
    %c0_i32_0 = arith.constant 0 : i32
    return %c0_i32, %arg0 : i32, i32
  }
}

</mosaic_0001>

<bundles_post_ra>
// kernel: cdn_select_forward.1
= control target key start
LH: loop header
LB: loop body
LE: loop exit
PB: predicated region body
PF: predicated region fallthrough
CT: control target
= control target key end

     0   :  { %vm123_vm0 = vcmask 1042432   ;;  %vm110_vm1 = vcmask 48128   ;;  %v1011_v1 = vmov 0   ;;  %vm388_vm2 = vcmask 523264   ;;  %s1282_s0 = inlined_call_operand.vmem [shape: bf16[6,128], index: 0, kind: input, shape index: {}]   ;;  %s1283_s1 = inlined_call_operand.vmem [shape: bf16[64,6], index: 1, kind: input, shape index: {}]   ;;  %s1284_s2 = inlined_call_operand.vmem [shape: f32[64,1], index: 2, kind: input, shape index: {}]   ;;  %s1285_s4 = inlined_call_operand.vmem [shape: f32[128,1], index: 4, kind: input, shape index: {}]   ;;  %s1286_s6 = inlined_call_operand.vmem [shape: f32[32,1], index: 6, kind: input, shape index: {}]   ;;  %s1287_s8 = inlined_call_operand.vmem [shape: f32[3,1], index: 8, kind: input, shape index: {}]   ;;  %s1288_s3 = inlined_call_operand.vmem [shape: bf16[128,64], index: 3, kind: input, shape index: {}]   ;;  %s1289_s5 = inlined_call_operand.vmem [shape: bf16[32,128], index: 5, kind: input, shape index: {}]   ;;  %s1290_s7 = inlined_call_operand.vmem [shape: bf16[3,32], index: 7, kind: input, shape index: {}]   ;;  %s1291_s9 = inlined_call_operand.vmem [shape: f32[3,128], index: 9, kind: output, shape index: {}]  }
   0x1   :  { %v33_v0 = vld [vmem:[%s1282_s0] sm:$0x7]  ;;  %935 = vset.pattern.permute.xlu0 %v1011_v1  ;;  %936 = vset.pattern.permute.xlu1 %v1011_v1  ;;  %v938_v4 = vld [vmem:[%s1283_s1 + $0x8] sm:$0xff]   ;;  %v939_v5 = vld [vmem:[%s1283_s1 + $0x10] sm:$0xff]  }
   0x2   :  { %931 = vmatprep.subr.msk.bf16.mxu0 %vm123_vm0, %v33_v0  ;;  %v125_v2 = vsel %vm123_vm0, %v33_v0, 0  ;;  %v937_v3 = vld [vmem:[%s1283_s1] sm:$0xff]   ;;  %v44_v7 = vld [vmem:[%s1284_s2 + $0x10] sm:$0xff]  ;;  %v43_v8 = vld [vmem:[%s1284_s2 + $0x8] sm:$0xff] }
   0x3   :  { %870 = vmatpush3.bf16.msra.mxu0 %v125_v2  ;;  %871 = vmatprep.mubr.msk.bf16.mxu0 %vm110_vm1, %v937_v3  ;;  %v42_v6 = vld [vmem:[%s1284_s2] sm:$0xff]  ;;  %v45_v9 = vld [vmem:[%s1284_s2 + $0x18] sm:$0xff]  ;;  %v47_v12 = vld [vmem:[%s1284_s2 + $0x28] sm:$0xff] }
   0x4   :  { %52 = vperm.xlu0 %935, %v42_v6   ;;  %62 = vperm.xlu1 %936, %v44_v7   ;;  %v940_v10 = vld [vmem:[%s1283_s1 + $0x18] sm:$0xff]   ;;  %v46_v11 = vld [vmem:[%s1284_s2 + $0x20] sm:$0xff]  ;;  %v48_v13 = vld [vmem:[%s1284_s2 + $0x30] sm:$0xff] }
   0x5   :  { %v49_v14 = vld [vmem:[%s1284_s2 + $0x38] sm:$0xff]  ;;  %v252_v15 = vld [vmem:[%s1285_s4] sm:$0xff]  ;;  %v253_v16 = vld [vmem:[%s1285_s4 + $0x8] sm:$0xff] }
   0x6   :  { %872 = vmatmul.mubr.msk.bf16.vlgmr.msra.gmra.mrb[0].mxu0 %vm110_vm1, %v938_v4  ;;  %v254_v17 = vld [vmem:[%s1285_s4 + $0x10] sm:$0xff]  ;;  %v255_v18 = vld [vmem:[%s1285_s4 + $0x18] sm:$0xff]  ;;  %v256_v19 = vld [vmem:[%s1285_s4 + $0x20] sm:$0xff] }
   0x7   :  { %875 = vmatprep.mubr.msk.bf16.mxu0 %vm110_vm1, %v939_v5  ;;  %v257_v20 = vld [vmem:[%s1285_s4 + $0x28] sm:$0xff]  ;;  %v258_v21 = vld [vmem:[%s1285_s4 + $0x30] sm:$0xff]  ;;  %v259_v22 = vld [vmem:[%s1285_s4 + $0x38] sm:$0xff] }
   0x8   :  { %57 = vperm.xlu0 %935, %v43_v8   ;;  %67 = vperm.xlu1 %936, %v45_v9   ;;  %v260_v23 = vld [vmem:[%s1285_s4 + $0x40] sm:$0xff]  ;;  %v261_v24 = vld [vmem:[%s1285_s4 + $0x48] sm:$0xff]  ;;  %v262_v25 = vld [vmem:[%s1285_s4 + $0x50] sm:$0xff] }
   0x9   :  { %v263_v26 = vld [vmem:[%s1285_s4 + $0x58] sm:$0xff]  ;;  %v264_v27 = vld [vmem:[%s1285_s4 + $0x60] sm:$0xff]  ;;  %v265_v28 = vld [vmem:[%s1285_s4 + $0x68] sm:$0xff] }
   0xa   :  { %v266_v29 = vld [vmem:[%s1285_s4 + $0x70] sm:$0xff]  ;;  %v267_v30 = vld [vmem:[%s1285_s4 + $0x78] sm:$0xff]  ;;  %v602_v31 = vld [vmem:[%s1286_s6] sm:$0xff] }
   0xb   :  { %v603_v32 = vld [vmem:[%s1286_s6 + $0x8] sm:$0xff]  ;;  %v604_v33 = vld [vmem:[%s1286_s6 + $0x10] sm:$0xff]  ;;  %v605_v34 = vld [vmem:[%s1286_s6 + $0x18] sm:$0xff] }
   0xc   :  { %72 = vperm.xlu0 %935, %v46_v11   ;;  %77 = vperm.xlu1 %936, %v47_v12   ;;  %v710_v35 = vld [vmem:[%s1287_s8] sm:$0x7] }
   0xd   :  { %v941_v36 = vld [vmem:[%s1288_s3] sm:$0xff]  }
   0xe   :  { %876 = vmatmul.mubr.msk.bf16.gmra.mrb[4].mxu0 %vm110_vm1, %v940_v10  ;;  %887 = vmatprep.mubr.msk.bf16.mxu1 %vm388_vm2, %v941_v36  ;;  %v945_v36 = vld [vmem:[%s1288_s3 + $0x20] sm:$0xff]  }
  0x10   :  { %82 = vperm.xlu0 %935, %v48_v13   ;;  %87 = vperm.xlu1 %936, %v49_v14  }
  0x14   :  { %270 = vperm.xlu0 %935, %v252_v15   ;;  %275 = vperm.xlu1 %936, %v253_v16  }
  0x18   :  { %280 = vperm.xlu0 %935, %v254_v17   ;;  %285 = vperm.xlu1 %936, %v255_v18  }
  0x1c   :  { %290 = vperm.xlu0 %935, %v256_v19   ;;  %295 = vperm.xlu1 %936, %v257_v20  }
  0x20   :  { %300 = vperm.xlu0 %935, %v258_v21   ;;  %305 = vperm.xlu1 %936, %v259_v22  }
  0x24   :  { %310 = vperm.xlu0 %935, %v260_v23   ;;  %315 = vperm.xlu1 %936, %v261_v24  }
  0x28   :  { %320 = vperm.xlu0 %935, %v262_v25   ;;  %325 = vperm.xlu1 %936, %v263_v26  }
  0x2c   :  { %330 = vperm.xlu0 %935, %v264_v27   ;;  %335 = vperm.xlu1 %936, %v265_v28  }
  0x30   :  { %340 = vperm.xlu0 %935, %v266_v29   ;;  %345 = vperm.xlu1 %936, %v267_v30  }
  0x34   :  { %608 = vperm.xlu0 %935, %v602_v31   ;;  %613 = vperm.xlu1 %936, %v603_v32  }
  0x38   :  { %618 = vperm.xlu0 %935, %v604_v33   ;;  %623 = vperm.xlu1 %936, %v605_v34   ;;  %v942_v33 = vld [vmem:[%s1288_s3 + $0x8] sm:$0xff]   ;;  %v943_v34 = vld [vmem:[%s1288_s3 + $0x10] sm:$0xff]  }
  0x3c   :  { %713 = vperm.xlu0 %935, %v710_v35   ;;  %v944_v35 = vld [vmem:[%s1288_s3 + $0x18] sm:$0xff]  }
  0x83   :  { %v53_v37 = vpop.permute.xlu0 %52  ;;  %v63_v38 = vpop.permute.xlu1 %62 }
  0x87   :  { %v58_v39 = vpop.permute.xlu0 %57  ;;  %v68_v40 = vpop.permute.xlu1 %67 }
  0x8b   :  { %v73_v44 = vpop.permute.xlu0 %72  ;;  %v78_v50 = vpop.permute.xlu1 %77 }
  0x8f   :  { %v83_v55 = vpop.permute.xlu0 %82  ;;  %v88_v59 = vpop.permute.xlu1 %87 }
  0xd9   :  { %v873_v41 = vpop.f32.mrb[0].mxu0 }
  0xda   :  { %v170_v42 = vadd.f32 %v873_v41, %v63_v38  ;;  %v161_v43 = vpop.f32.mrb[1].mxu0  ;;  %v947_v38 = vld [vmem:[%s1288_s3 + $0x30] sm:$0xff]   ;;  %v271_v41 = vpop.permute.xlu0 %270 }
  0xdb   :  { %v162_v45 = vadd.f32 %v161_v43, %v53_v37  ;;  %v874_v46 = vpop.f32.mrb[2].mxu0  ;;  %v946_v37 = vld [vmem:[%s1288_s3 + $0x28] sm:$0xff]  }
  0xdc   :  { %v204_v47 = vmul.f32 1.442695, %v170_v42  ;;  %v173_v48 = vadd.f32 %v874_v46, %v68_v40  ;;  %v164_v49 = vpop.f32.mrb[3].mxu0  ;;  %vm194_vm3 = vcmp.gt.f32.partialorder %v170_v42, 0.0  ;;  %v949_v40 = vld [vmem:[%s1289_s5] sm:$0xff]  }
  0xdd   :  { %v200_v51 = vmul.f32 1.442695, %v162_v45  ;;  %v165_v52 = vadd.f32 %v164_v49, %v58_v39  ;;  %vm192_vm5 = vcmp.gt.f32.partialorder %v162_v45, 0.0  ;;  %v948_v39 = vld [vmem:[%s1288_s3 + $0x38] sm:$0xff]   ;;  %919 = vmatprep.mubr.bf16.mxu0 %v949_v40 }
  0xde   :  { %951 = vpow2.f32 %v204_v47  ;;  %v206_v53 = vmul.f32 1.442695, %v173_v48  ;;  %vm195_vm4 = vcmp.gt.f32.partialorder %v173_v48, 0.0  ;;  %v281_v43 = vpop.permute.xlu0 %280 }
  0xdf   :  { %953 = vpow2.f32 %v200_v51  ;;  %v202_v54 = vmul.f32 1.442695, %v165_v52  ;;  %vm193_vm6 = vcmp.gt.f32.partialorder %v165_v52, 0.0 }
  0xe0   :  { %955 = vpow2.f32 %v206_v53 }
  0xe1   :  { %957 = vpow2.f32 %v202_v54  ;;  %v877_v56 = vpop.f32.mrb[4].mxu0 }
  0xe2   :  { %v186_v57 = vadd.f32 %v877_v56, %v83_v55  ;;  %v177_v58 = vpop.f32.mrb[5].mxu0 }
  0xe3   :  { %v178_v60 = vadd.f32 %v177_v58, %v73_v44  ;;  %v878_v61 = vpop.f32.mrb[6].mxu0 }
  0xe4   :  { %v212_v62 = vmul.f32 1.442695, %v186_v57  ;;  %v189_v63 = vadd.f32 %v878_v61, %v88_v59  ;;  %v180_v0 = vpop.f32.mrb[7].mxu0  ;;  %vm198_vm7 = vcmp.gt.f32.partialorder %v186_v57, 0.0 }
  0xe5   :  { %v208_v1 = vmul.f32 1.442695, %v178_v60  ;;  %v181_v2 = vadd.f32 %v180_v0, %v78_v50  ;;  %vm196_vm9 = vcmp.gt.f32.partialorder %v178_v60, 0.0 }
  0xe6   :  { %959 = vpow2.f32 %v212_v62  ;;  %v214_v3 = vmul.f32 1.442695, %v189_v63  ;;  %vm199_vm8 = vcmp.gt.f32.partialorder %v189_v63, 0.0 }
  0xe7   :  { %961 = vpow2.f32 %v208_v1  ;;  %v210_v4 = vmul.f32 1.442695, %v181_v2  ;;  %vm197_vm10 = vcmp.gt.f32.partialorder %v181_v2, 0.0 }
  0xe8   :  { %v952_v5 = vpop.eup %951  ;;  %963 = vpow2.f32 %v214_v3 }
  0xe9   :  { %v954_v6 = vpop.eup %953  ;;  %v794_v7 = vadd.f32 -1.0, %v952_v5  ;;  %965 = vpow2.f32 %v210_v4 }
  0xea   :  { %v956_v8 = vpop.eup %955  ;;  %v792_v9 = vadd.f32 -1.0, %v954_v6 }
  0xeb   :  { %v958_v10 = vpop.eup %957  ;;  %v795_v11 = vadd.f32 -1.0, %v956_v8  ;;  %v226_v13 = vsel %vm194_vm3, %v170_v42, %v794_v7  ;;  %v276_v42 = vpop.permute.xlu1 %275 }
  0xec   :  { %v793_v12 = vadd.f32 -1.0, %v958_v10  ;;  %v224_v15 = vsel %vm192_vm5, %v162_v45, %v792_v9  ;;  %v291_v45 = vpop.permute.xlu0 %290 }
  0xed   :  { %v227_v14 = vsel %vm195_vm4, %v173_v48, %v795_v11 }
  0xee   :  { %v225_v16 = vsel %vm193_vm6, %v165_v52, %v793_v12  ;;  %v249_v17 = vpack.c.bf16 %v227_v14, %v226_v13 }
  0xef   :  { %v248_v18 = vpack.c.bf16 %v225_v16, %v224_v15  ;;  %v286_v44 = vpop.permute.xlu1 %285 }
  0xf0   :  { %v960_v19 = vpop.eup %959  ;;  %v301_v47 = vpop.permute.xlu0 %300 }
  0xf1   :  { %v962_v20 = vpop.eup %961  ;;  %v798_v21 = vadd.f32 -1.0, %v960_v19  ;;  %879 = vmatprep.subr.bf16.mxu1 %v248_v18 }
  0xf2   :  { %v964_v22 = vpop.eup %963  ;;  %v796_v23 = vadd.f32 -1.0, %v962_v20  ;;  %880 = vmatpush3.bf16.msra.mxu1 %v248_v18 }
  0xf3   :  { %v966_v24 = vpop.eup %965  ;;  %v799_v25 = vadd.f32 -1.0, %v964_v22  ;;  %881 = vmatprep.subr.bf16.mxu1 %v249_v17  ;;  %v230_v27 = vsel %vm198_vm7, %v186_v57, %v798_v21  ;;  %v296_v46 = vpop.permute.xlu1 %295 }
  0xf4   :  { %v797_v26 = vadd.f32 -1.0, %v966_v24  ;;  %v228_v29 = vsel %vm196_vm9, %v178_v60, %v796_v23  ;;  %v311_v60 = vpop.permute.xlu0 %310 }
  0xf5   :  { %v231_v28 = vsel %vm199_vm8, %v189_v63, %v799_v25 }
  0xf6   :  { %882 = vmatpush3.bf16.msra.mxu1 %v249_v17  ;;  %v229_v30 = vsel %vm197_vm10, %v181_v2, %v797_v26  ;;  %v251_v31 = vpack.c.bf16 %v231_v28, %v230_v27 }
  0xf7   :  { %v250_v32 = vpack.c.bf16 %v229_v30, %v228_v29  ;;  %v306_v51 = vpop.permute.xlu1 %305 }
  0xf8   :  { %v321_v7 = vpop.permute.xlu0 %320 }
  0xf9   :  { %883 = vmatprep.subr.bf16.mxu1 %v250_v32 }
  0xfa   :  { %884 = vmatpush3.bf16.msra.mxu1 %v250_v32 }
  0xfb   :  { %885 = vmatprep.subr.bf16.mxu1 %v251_v31  ;;  %v316_v62 = vpop.permute.xlu1 %315 }
  0xfc   :  { %v331_v21 = vpop.permute.xlu0 %330 }
  0xfe   :  { %886 = vmatpush3.bf16.msra.mxu1 %v251_v31 }
  0xff   :  { %v326_v11 = vpop.permute.xlu1 %325 }
 0x101   :  { %888 = vmatmul.mubr.msk.bf16.vlgmr.msra.gmra.mrb[0].mxu1 %vm388_vm2, %v942_v33 }
 0x102   :  { %891 = vmatprep.mubr.msk.bf16.mxu1 %vm388_vm2, %v943_v34 }
 0x103   :  { %v336_v30 = vpop.permute.xlu1 %335 }
 0x109   :  { %892 = vmatmul.mubr.msk.bf16.gmra.mrb[4].mxu1 %vm388_vm2, %v944_v35 }
 0x10a   :  { %895 = vmatprep.mubr.msk.bf16.mxu1 %vm388_vm2, %v945_v36 }
 0x111   :  { %896 = vmatmul.mubr.msk.bf16.gmra.mrb[8].mxu1 %vm388_vm2, %v946_v37 }
 0x112   :  { %899 = vmatprep.mubr.msk.bf16.mxu1 %vm388_vm2, %v947_v38 }
 0x119   :  { %900 = vmatmul.mubr.msk.bf16.gmra.mrb[12].mxu1 %vm388_vm2, %v948_v39 }
 0x1d4   :  { %v889_v48 = vpop.f32.mrb[0].mxu1 }
 0x1d5   :  { %v1207_v49 = vadd.f32 %v889_v48, %v281_v43  ;;  %v447_v50 = vpop.f32.mrb[1].mxu1 }
 0x1d6   :  { %v448_v52 = vadd.f32 %v447_v50, %v271_v41  ;;  %v890_v53 = vpop.f32.mrb[2].mxu1 }
 0x1d7   :  { %v530_v54 = vmul.f32 1.442695, %v1207_v49  ;;  %v1210_v55 = vadd.f32 %v890_v53, %v286_v44  ;;  %v450_v56 = vpop.f32.mrb[3].mxu1  ;;  %vm512_vm11 = vcmp.gt.f32.partialorder %v1207_v49, 0.0 }
 0x1d8   :  { %v526_v57 = vmul.f32 1.442695, %v448_v52  ;;  %v451_v58 = vadd.f32 %v450_v56, %v276_v42  ;;  %vm510_vm12 = vcmp.gt.f32.partialorder %v448_v52, 0.0  ;;  %v341_v42 = vpop.permute.xlu0 %340 }
 0x1d9   :  { %967 = vpow2.f32 %v530_v54  ;;  %v532_v59 = vmul.f32 1.442695, %v1210_v55  ;;  %vm513_vm14 = vcmp.gt.f32.partialorder %v1210_v55, 0.0 }
 0x1da   :  { %969 = vpow2.f32 %v526_v57  ;;  %v528_v61 = vmul.f32 1.442695, %v451_v58  ;;  %vm511_vm13 = vcmp.gt.f32.partialorder %v451_v58, 0.0 }
 0x1db   :  { %971 = vpow2.f32 %v532_v59 }
 0x1dc   :  { %973 = vpow2.f32 %v528_v61  ;;  %v893_v63 = vpop.f32.mrb[4].mxu1 }
 0x1dd   :  { %v1213_v0 = vadd.f32 %v893_v63, %v301_v47  ;;  %v463_v1 = vpop.f32.mrb[5].mxu1 }
 0x1de   :  { %v1215_v2 = vadd.f32 %v463_v1, %v291_v45  ;;  %v894_v3 = vpop.f32.mrb[6].mxu1 }
 0x1df   :  { %v538_v4 = vmul.f32 1.442695, %v1213_v0  ;;  %v1218_v5 = vadd.f32 %v894_v3, %v306_v51  ;;  %v466_v6 = vpop.f32.mrb[7].mxu1  ;;  %v346_v51 = vpop.permute.xlu1 %345  ;;  %vm516_vm15 = vcmp.gt.f32.partialorder %v1213_v0, 0.0 }
 0x1e0   :  { %v534_v8 = vmul.f32 1.442695, %v1215_v2  ;;  %v1221_v9 = vadd.f32 %v466_v6, %v296_v46  ;;  %vm514_vm1 = vcmp.gt.f32.partialorder %v1215_v2, 0.0 }
 0x1e1   :  { %975 = vpow2.f32 %v538_v4  ;;  %v540_v10 = vmul.f32 1.442695, %v1218_v5  ;;  %vm517_vm3 = vcmp.gt.f32.partialorder %v1218_v5, 0.0 }
 0x1e2   :  { %977 = vpow2.f32 %v534_v8  ;;  %v536_v12 = vmul.f32 1.442695, %v1221_v9  ;;  %vm515_vm2 = vcmp.gt.f32.partialorder %v1221_v9, 0.0 }
 0x1e3   :  { %v968_v13 = vpop.eup %967  ;;  %979 = vpow2.f32 %v540_v10 }
 0x1e4   :  { %v970_v14 = vpop.eup %969  ;;  %981 = vpow2.f32 %v536_v12  ;;  %v897_v15 = vpop.f32.mrb[8].mxu1  ;;  %v818_v22 = vadd.f32 -1.0, %v968_v13 }
 0x1e5   :  { %v972_v16 = vpop.eup %971  ;;  %v816_v17 = vadd.f32 -1.0, %v970_v14  ;;  %v1225_v18 = vadd.f32 %v897_v15, %v321_v7  ;;  %v479_v19 = vpop.f32.mrb[9].mxu1 }
 0x1e6   :  { %v974_v20 = vpop.eup %973  ;;  %v1228_v23 = vadd.f32 %v479_v19, %v311_v60  ;;  %v898_v24 = vpop.f32.mrb[10].mxu1  ;;  %v819_v25 = vadd.f32 -1.0, %v972_v16  ;;  %v576_v39 = vsel %vm512_vm11, %v1207_v49, %v818_v22 }
 0x1e7   :  { %v817_v26 = vadd.f32 -1.0, %v974_v20  ;;  %v546_v27 = vmul.f32 1.442695, %v1225_v18  ;;  %v1231_v28 = vadd.f32 %v898_v24, %v326_v11  ;;  %v482_v29 = vpop.f32.mrb[11].mxu1  ;;  %v574_v34 = vsel %vm510_vm12, %v448_v52, %v816_v17 }
 0x1e8   :  { %v542_v31 = vmul.f32 1.442695, %v1228_v23  ;;  %v1234_v32 = vadd.f32 %v482_v29, %v316_v62  ;;  %v577_v40 = vsel %vm513_vm14, %v1210_v55, %v819_v25  ;;  %vm520_vm4 = vcmp.gt.f32.partialorder %v1225_v18, 0.0 }
 0x1e9   :  { %983 = vpow2.f32 %v546_v27  ;;  %v548_v33 = vmul.f32 1.442695, %v1231_v28  ;;  %v575_v35 = vsel %vm511_vm13, %v451_v58, %v817_v26  ;;  %v595_v44 = vpack.c.bf16 %v577_v40, %v576_v39 }
 0x1ea   :  { %985 = vpow2.f32 %v542_v31  ;;  %v544_v36 = vmul.f32 1.442695, %v1234_v32  ;;  %v594_v37 = vpack.c.bf16 %v575_v35, %v574_v34  ;;  %vm521_vm5 = vcmp.gt.f32.partialorder %v1231_v28, 0.0  ;;  %v609_v35 = vpop.permute.xlu0 %608 }
 0x1eb   :  { %v976_v38 = vpop.eup %975  ;;  %987 = vpow2.f32 %v548_v33  ;;  %vm518_vm6 = vcmp.gt.f32.partialorder %v1228_v23, 0.0  ;;  %vm519_vm7 = vcmp.gt.f32.partialorder %v1234_v32, 0.0  ;;  %v950_v33 = vld [vmem:[%s1289_s5 + $0x8] sm:$0xff]   ;;  %v1012_v34 = vmov 0.0  }
 0x1ec   :  { %v978_v41 = vpop.eup %977  ;;  %989 = vpow2.f32 %v544_v36  ;;  %v901_v43 = vpop.f32.mrb[12].mxu1  ;;  %903 = vmatprep.subr.bf16.mxu0 %v594_v37  ;;  %v822_v52 = vadd.f32 -1.0, %v976_v38  ;;  %vm1013_vm12 = vmmov 0  }
 0x1ed   :  { %v980_v45 = vpop.eup %979  ;;  %v820_v46 = vadd.f32 -1.0, %v978_v41  ;;  %v1243_v47 = vadd.f32 %v901_v43, %v341_v42  ;;  %v495_v48 = vpop.f32.mrb[13].mxu1  ;;  %904 = vmatpush3.bf16.msra.mxu0 %v594_v37 }
 0x1ee   :  { %v982_v50 = vpop.eup %981  ;;  %v1246_v49 = vadd.f32 %v495_v48, %v331_v21  ;;  %v902_v53 = vpop.f32.mrb[14].mxu1  ;;  %905 = vmatprep.subr.bf16.mxu0 %v595_v44  ;;  %v823_v54 = vadd.f32 -1.0, %v980_v45  ;;  %v580_v6 = vsel %vm516_vm15, %v1213_v0, %v822_v52 }
 0x1ef   :  { %v821_v55 = vadd.f32 -1.0, %v982_v50  ;;  %v554_v56 = vmul.f32 1.442695, %v1243_v47  ;;  %v507_v57 = vadd.f32 %v902_v53, %v346_v51  ;;  %v498_v58 = vpop.f32.mrb[15].mxu1  ;;  %v578_v62 = vsel %vm514_vm1, %v1215_v2, %v820_v46  ;;  %v614_v36 = vpop.permute.xlu1 %613 }
 0x1f0   :  { %v550_v59 = vmul.f32 1.442695, %v1246_v49  ;;  %v499_v60 = vadd.f32 %v498_v58, %v336_v30  ;;  %v581_v7 = vsel %vm517_vm3, %v1218_v5, %v823_v54  ;;  %vm524_vm8 = vcmp.gt.f32.partialorder %v1243_v47, 0.0  ;;  %v619_v37 = vpop.permute.xlu0 %618 }
 0x1f1   :  { %991 = vpow2.f32 %v554_v56  ;;  %v556_v61 = vmul.f32 1.442695, %v507_v57  ;;  %906 = vmatpush3.bf16.msra.mxu0 %v595_v44  ;;  %v579_v63 = vsel %vm515_vm2, %v1221_v9, %v821_v55  ;;  %v597_v2 = vpack.c.bf16 %v581_v7, %v580_v6 }
 0x1f2   :  { %993 = vpow2.f32 %v550_v59  ;;  %v552_v1 = vmul.f32 1.442695, %v499_v60  ;;  %v596_v3 = vpack.c.bf16 %v579_v63, %v578_v62  ;;  %vm525_vm9 = vcmp.gt.f32.partialorder %v507_v57, 0.0 }
 0x1f3   :  { %v984_v4 = vpop.eup %983  ;;  %995 = vpow2.f32 %v556_v61  ;;  %vm522_vm10 = vcmp.gt.f32.partialorder %v1246_v49, 0.0  ;;  %vm523_vm11 = vcmp.gt.f32.partialorder %v499_v60, 0.0  ;;  %v624_v41 = vpop.permute.xlu1 %623  ;;  %vm716_vm2 = vcmask 261120  }
 0x1f4   :  { %v986_v8 = vpop.eup %985  ;;  %v826_v10 = vadd.f32 -1.0, %v984_v4  ;;  %997 = vpow2.f32 %v552_v1  ;;  %907 = vmatprep.subr.bf16.mxu0 %v596_v3  ;;  %v714_v4 = vpop.permute.xlu0 %713 }
 0x1f5   :  { %v988_v11 = vpop.eup %987  ;;  %v824_v9 = vadd.f32 -1.0, %v986_v8  ;;  %908 = vmatpush3.bf16.msra.mxu0 %v596_v3  ;;  %v707_v3 = vld [vmem:[%s1290_s7] sm:$0x3] }
 0x1f6   :  { %v990_v12 = vpop.eup %989  ;;  %v827_v13 = vadd.f32 -1.0, %v988_v11  ;;  %909 = vmatprep.subr.bf16.mxu0 %v597_v2  ;;  %v584_v0 = vsel %vm520_vm4, %v1225_v18, %v826_v10 }
 0x1f7   :  { %v825_v14 = vadd.f32 -1.0, %v990_v12  ;;  %v582_v15 = vsel %vm518_vm6, %v1228_v23, %v824_v9 }
 0x1f8   :  { %v585_v5 = vsel %vm521_vm5, %v1231_v28, %v827_v13 }
 0x1f9   :  { %910 = vmatpush3.bf16.msra.mxu0 %v597_v2  ;;  %v583_v16 = vsel %vm519_vm7, %v1234_v32, %v825_v14  ;;  %v599_v17 = vpack.c.bf16 %v585_v5, %v584_v0 }
 0x1fa   :  { %v598_v19 = vpack.c.bf16 %v583_v16, %v582_v15 }
 0x1fb   :  { %v992_v20 = vpop.eup %991 }
 0x1fc   :  { %v994_v21 = vpop.eup %993  ;;  %v830_v22 = vadd.f32 -1.0, %v992_v20  ;;  %911 = vmatprep.subr.bf16.mxu0 %v598_v19 }
 0x1fd   :  { %v996_v24 = vpop.eup %995  ;;  %v828_v25 = vadd.f32 -1.0, %v994_v21  ;;  %912 = vmatpush3.bf16.msra.mxu0 %v598_v19 }
 0x1fe   :  { %v998_v26 = vpop.eup %997  ;;  %v831_v27 = vadd.f32 -1.0, %v996_v24  ;;  %913 = vmatprep.subr.bf16.mxu0 %v599_v17  ;;  %v588_v23 = vsel %vm524_vm8, %v1243_v47, %v830_v22 }
 0x1ff   :  { %v829_v18 = vadd.f32 -1.0, %v998_v26  ;;  %v586_v29 = vsel %vm522_vm10, %v1246_v49, %v828_v25 }
 0x200   :  { %v589_v28 = vsel %vm525_vm9, %v507_v57, %v831_v27 }
 0x201   :  { %914 = vmatpush3.bf16.msra.mxu0 %v599_v17  ;;  %v587_v30 = vsel %vm523_vm11, %v499_v60, %v829_v18  ;;  %v601_v31 = vpack.c.bf16 %v589_v28, %v588_v23 }
 0x202   :  { %v600_v32 = vpack.c.bf16 %v587_v30, %v586_v29 }
 0x204   :  { %915 = vmatprep.subr.bf16.mxu0 %v600_v32 }
 0x205   :  { %916 = vmatpush3.bf16.msra.mxu0 %v600_v32 }
 0x206   :  { %917 = vmatprep.subr.bf16.mxu0 %v601_v31 }
 0x209   :  { %918 = vmatpush3.bf16.msra.mxu0 %v601_v31 }
 0x20a   :  { %923 = vmatprep.subr.bf16.mxu0 %v1012_v34 }
 0x20c   :  { %920 = vmatmul.mubr.bf16.vlgmr.msra.gmra.mrb[8].mxu0 %v950_v33 }
 0x20d   :  { %927 = vmatprep.mubr.msk.bf16.mxu0 %vm1013_vm12, %v1012_v34 }
 0x2df   :  { %v921_v38 = vpop.f32.mrb[8].mxu0 }
 0x2e0   :  { %v681_v39 = vadd.f32 %v921_v38, %v619_v37  ;;  %v672_v40 = vpop.f32.mrb[9].mxu0 }
 0x2e1   :  { %v673_v42 = vadd.f32 %v672_v40, %v609_v35  ;;  %v922_v43 = vpop.f32.mrb[10].mxu0 }
 0x2e2   :  { %v695_v44 = vmul.f32 1.442695, %v681_v39  ;;  %v684_v45 = vadd.f32 %v922_v43, %v624_v41  ;;  %v675_v46 = vpop.f32.mrb[11].mxu0  ;;  %vm689_vm13 = vcmp.gt.f32.partialorder %v681_v39, 0.0 }
 0x2e3   :  { %v691_v47 = vmul.f32 1.442695, %v673_v42  ;;  %v676_v48 = vadd.f32 %v675_v46, %v614_v36  ;;  %vm687_vm15 = vcmp.gt.f32.partialorder %v673_v42, 0.0 }
 0x2e4   :  { %999 = vpow2.f32 %v695_v44  ;;  %v697_v50 = vmul.f32 1.442695, %v684_v45  ;;  %vm690_vm14 = vcmp.gt.f32.partialorder %v684_v45, 0.0 }
 0x2e5   :  { %1001 = vpow2.f32 %v691_v47  ;;  %v693_v51 = vmul.f32 1.442695, %v676_v48  ;;  %vm688_vm1 = vcmp.gt.f32.partialorder %v676_v48, 0.0 }
 0x2e6   :  { %1003 = vpow2.f32 %v697_v50 }
 0x2e7   :  { %1005 = vpow2.f32 %v693_v51 }
 0x2ee   :  { %v1000_v52 = vpop.eup %999 }
 0x2ef   :  { %v1002_v49 = vpop.eup %1001  ;;  %v836_v53 = vadd.f32 -1.0, %v1000_v52 }
 0x2f0   :  { %v1004_v54 = vpop.eup %1003  ;;  %v834_v55 = vadd.f32 -1.0, %v1002_v49 }
 0x2f1   :  { %v1006_v56 = vpop.eup %1005  ;;  %v837_v57 = vadd.f32 -1.0, %v1004_v54  ;;  %v705_v59 = vsel %vm689_vm13, %v681_v39, %v836_v53 }
 0x2f2   :  { %v835_v58 = vadd.f32 -1.0, %v1006_v56  ;;  %v703_v61 = vsel %vm687_vm15, %v673_v42, %v834_v55 }
 0x2f3   :  { %v706_v60 = vsel %vm690_vm14, %v684_v45, %v837_v57 }
 0x2f4   :  { %v709_v62 = vpack.c.bf16 %v706_v60, %v705_v59  ;;  %v704_v63 = vsel %vm688_vm1, %v676_v48, %v835_v58 }
 0x2f5   :  { %v708_v1 = vpack.c.bf16 %v704_v63, %v703_v61 }
 0x2f7   :  { %924 = vmatpush3.bf16.msra.mxu0 %v708_v1 }
 0x2f8   :  { %925 = vmatprep.subr.bf16.mxu0 %v1012_v34 }
 0x2fb   :  { %926 = vmatpush3.bf16.msra.mxu0 %v709_v62 }
 0x2fe   :  { %928 = vmatmul.mubr.msk.bf16.vlgmr.msra.gmra.mrb[12].mxu0 %vm716_vm2, %v707_v3 }
 0x3d1   :  { %v754_v6 = vpop.f32.mrb[12].mxu0 }
 0x3d2   :  { %v755_v7 = vadd.f32 %v754_v6, %v714_v4  ;;  %v929_v8 = vpop.f32.mrb[13].mxu0 }
 0x3d3   :  { %v757_v10 = vpop.f32.mrb[14].mxu0 }
 0x3d4   :  { %v760_v2 = vsel %vm123_vm0, %v755_v7, -inf  ;;  %v930_v11 = vpop.f32.mrb[15].mxu0 }
 0x3d5   :  { %v761_v9 = vrot.slane %v760_v2, 4 }
 0x3d7   :  { %v762_v12 = vmax.f32 %v760_v2, %v761_v9 }
 0x3d9   :  { %v763_v13 = vrot.slane %v762_v12, 2 }
 0x3db   :  { %v764_v14 = vmax.f32 %v762_v12, %v763_v13 }
 0x3dd   :  { %v765_v0 = vrot.slane %v764_v14, 1 }
 0x3df   :  { %v766_v5 = vmax.f32 %v764_v14, %v765_v0 }
 0x3e1   :  { %v767_v15 = vsub.f32 %v755_v7, %v766_v5 }
 0x3e3   :  { %v768_v16 = vmul.f32 1.442695, %v767_v15 }
 0x3e5   :  { %1007 = vpow2.f32 %v768_v16 }
 0x3ef   :  { %v1008_v17 = vpop.eup %1007 }
 0x3f0   :  { %v770_v19 = vsel %vm123_vm0, %v1008_v17, 0.0 }
 0x3f1   :  { %v771_v20 = vrot.slane %v770_v19, 4 }
 0x3f3   :  { %v772_v21 = vadd.f32 %v771_v20, %v770_v19 }
 0x3f5   :  { %v773_v22 = vrot.slane %v772_v21, 2 }
 0x3f7   :  { %v774_v24 = vadd.f32 %v773_v22, %v772_v21 }
 0x3f9   :  { %v775_v25 = vrot.slane %v774_v24, 1 }
 0x3fb   :  { %v776_v26 = vadd.f32 %v775_v25, %v774_v24 }
 0x3fd   :  { %1009 = vrcp.f32 %v776_v26 }
 0x407   :  { %v1010_v27 = vpop.eup %1009 }
 0x408   :  { %v778_v18 = vmul.f32 %v1010_v27, %v1008_v17 }
 0x40a   :  { %779 = vst [vmem:[%s1291_s9] sm:$0x7] %v778_v18 }

</bundles_post_ra>
